<compile_context>
chip_gen: v7x
topology: tpu7x:2x2x1
jax: 0.10.0
libtpu: 0.0.40
codegen_flags: <defaults>
</compile_context>

<pallas_src>
import functools

import jax
import jax.numpy as jnp
from jax.experimental import pallas as pl
from jax.experimental.pallas import tpu as pltpu


def _round_up(n, m):
    return ((n + m - 1) // m) * m


def _vmem_cap_bytes():
    """Generation-aware scoped-VMEM cap: physical VMEM minus spill headroom."""
    try:
        phys = int(pltpu.get_tpu_info().vmem_capacity_bytes)
    except Exception:
        phys = 64 << 20  # conservative: smallest physical VMEM (v7x per-TC)
    return max(phys - (12 << 20), phys // 2)


def mlp_kernel(x_ref, w1_ref, b1_ref, w2_ref, b2_ref, w3_ref, b3_ref, o_ref):
    # layer 1 + ReLU (f32 accumulation on the MXU regardless of operand dtype);
    # the cast of the streamed x tile happens here (VPU-cheap), not in HBM.
    x = x_ref[...].astype(w1_ref.dtype)
    h = jnp.dot(x, w1_ref[...], preferred_element_type=jnp.float32)
    h = jnp.maximum(h + b1_ref[...], 0.0)
    # layer 2 + ReLU
    h = jnp.dot(h.astype(w2_ref.dtype), w2_ref[...],
                preferred_element_type=jnp.float32)
    h = jnp.maximum(h + b2_ref[...], 0.0)
    # layer 3 (output)
    y = jnp.dot(h.astype(w3_ref.dtype), w3_ref[...],
                preferred_element_type=jnp.float32)
    o_ref[...] = (y + b3_ref[...]).astype(o_ref.dtype)


def prepare_params(params, *, compute_dtype=jnp.float32, lane=128):
    """One-time weight preparation (call at init, NOT per forward call).

    Transposes PyTorch-convention weights (out, in) -> (in, out), zero-pads the
    MXU output-facing dims (hidden, d_out) to multiples of `lane` (128), casts
    weights to `compute_dtype` (biases stay f32 and are added to the f32
    accumulator).  The first contraction dim (d_in) is deliberately NOT padded:
    x streams at its true byte count and Mosaic pads the contraction in VMEM.
    """
    d_in = params["w1"].shape[1]
    hid = params["w1"].shape[0]
    d_out = params["w3"].shape[0]
    h_p = _round_up(hid, lane)
    d_out_p = _round_up(d_out, lane)

    def pad2(a, rows, cols):
        return jnp.pad(a, ((0, rows - a.shape[0]), (0, cols - a.shape[1])))

    def pad_bias(b, cols):
        return jnp.pad(b, (0, cols - b.shape[0])).reshape(1, cols).astype(jnp.float32)

    prep = {
        "w1t": pad2(params["w1"].T, d_in, h_p).astype(compute_dtype),     # (d_in, h_p)
        "w2t": pad2(params["w2"].T, h_p, h_p).astype(compute_dtype),      # (h_p, h_p)
        "w3t": pad2(params["w3"].T, h_p, d_out_p).astype(compute_dtype),  # (h_p, d_out_p)
        "b1": pad_bias(params["b1"], h_p),
        "b2": pad_bias(params["b2"], h_p),
        "b3": pad_bias(params["b3"], d_out_p),
    }
    meta = dict(d_in=d_in, d_out=d_out, h_p=h_p, d_out_p=d_out_p,
                compute_dtype=compute_dtype)
    return prep, meta


def mlp_forward(x, prep, meta, *, block_batch=512):
    """Forward pass of the 3-layer MLP using pre-prepared (padded) weights."""
    B, d_in = x.shape
    assert d_in == meta["d_in"], "input feature dim mismatch"
    h_p, d_out_p = meta["h_p"], meta["d_out_p"]
    cdt = jnp.dtype(meta["compute_dtype"])
    out_dtype = x.dtype

    # Batch tile: multiple of the sublane packing width.  Aim for an even
    # number of grid steps of roughly equal size so the "parallel" batch axis
    # load-balances across v7x's 2 TensorCores; no wrapper-side row padding --
    # the ragged last block is handled by Pallas store masking.
    sub = 16 if cdt.itemsize < 4 else 8
    n_tiles = pl.cdiv(B, block_batch)
    if B > sub:
        n_tiles = max(n_tiles, 2)
        if n_tiles % 2:
            n_tiles += 1
    tb = min(_round_up(pl.cdiv(B, n_tiles), sub), _round_up(B, sub))
    grid = (pl.cdiv(B, tb),)

    # VMEM budget: 1x weights/biases (single-buffered) + 2x streamed x/out
    # tiles (double-buffered) + f32 intermediates + margin, capped per chip.
    # TODO(synk): for very large H on v7x, K-chunk w2 on a second "arbitrary"
    # grid axis (f32 accumulator scratch + pl.when init/finalize) and/or use
    # compute_dtype=bf16 so the weight set stays resident under 64 MiB.
    w_bytes = (cdt.itemsize * (d_in * h_p + h_p * h_p + h_p * d_out_p)
               + 4 * (2 * h_p + d_out_p))
    io_bytes = tb * (d_in * x.dtype.itemsize + d_out_p * jnp.dtype(out_dtype).itemsize)
    h_bytes = 4 * tb * (2 * h_p + d_out_p)
    vmem_bytes = int(min(max(w_bytes + 2 * io_bytes + h_bytes + (2 << 20), 8 << 20),
                         _vmem_cap_bytes()))

    resident = pl.Buffered(1)  # grid-invariant inputs: no double buffering
    out = pl.pallas_call(
        mlp_kernel,
        out_shape=jax.ShapeDtypeStruct((B, d_out_p), out_dtype),
        grid_spec=pltpu.PrefetchScalarGridSpec(
            num_scalar_prefetch=0,
            grid=grid,
            in_specs=[
                # x tile streamed at its true feature width (== full array dim).
                pl.BlockSpec((tb, d_in), lambda i: (i, 0)),
                pl.BlockSpec((d_in, h_p), lambda i: (0, 0), pipeline_mode=resident),
                pl.BlockSpec((1, h_p), lambda i: (0, 0), pipeline_mode=resident),
                pl.BlockSpec((h_p, h_p), lambda i: (0, 0), pipeline_mode=resident),
                pl.BlockSpec((1, h_p), lambda i: (0, 0), pipeline_mode=resident),
                pl.BlockSpec((h_p, d_out_p), lambda i: (0, 0), pipeline_mode=resident),
                pl.BlockSpec((1, d_out_p), lambda i: (0, 0), pipeline_mode=resident),
            ],
            out_specs=pl.BlockSpec((tb, d_out_p), lambda i: (i, 0)),  # lane-dense
        ),
        compiler_params=pltpu.CompilerParams(
            dimension_semantics=("parallel",),
            vmem_limit_bytes=vmem_bytes,
        ),
    )(x, prep["w1t"], prep["b1"], prep["w2t"], prep["b2"], prep["w3t"], prep["b3"])

    # Strip only the lane padding of the output columns (batch is exact).
    return out[:, :meta["d_out"]]


def linear_regression_forward(x, params, *, block_batch=512,
                              compute_dtype=jnp.float32):
    """Convenience one-shot wrapper (prepares weights then runs the kernel)."""
    prep, meta = prepare_params(params, compute_dtype=compute_dtype)
    return mlp_forward(x, prep, meta, block_batch=block_batch)


def init_params(key, input_size, hidden_size, output_size, dtype=jnp.float32):
    """Deterministic synthetic init (PyTorch Linear shapes: weight = (out, in))."""
    ks = jax.random.split(key, 6)

    def uniform(k, shape, fan_in):
        bound = 1.0 / jnp.sqrt(fan_in)
        return jax.random.uniform(k, shape, dtype, -bound, bound)

    return {
        "w1": uniform(ks[0], (hidden_size, input_size), input_size),
        "b1": uniform(ks[1], (hidden_size,), input_size),
        "w2": uniform(ks[2], (hidden_size, hidden_size), hidden_size),
        "b2": uniform(ks[3], (hidden_size,), hidden_size),
        "w3": uniform(ks[4], (output_size, hidden_size), hidden_size),
        "b3": uniform(ks[5], (output_size,), hidden_size),
    }


def reference_forward(x, p):
    h = jnp.maximum(x @ p["w1"].T + p["b1"], 0.0)
    h = jnp.maximum(h @ p["w2"].T + p["b2"], 0.0)
    return h @ p["w3"].T + p["b3"]


if __name__ == "__main__":
    key = jax.random.PRNGKey(0)
    k_x, k_p = jax.random.split(key)

    # Small module shapes; batch=300 exercises a 2-step balanced grid
    # (tb=152 -> tiles of 152 and 148 rows, ragged last block masked).
    batch, input_size, hidden_size, output_size = 300, 16, 32, 4
    x = jax.random.normal(k_x, (batch, input_size), jnp.float32)
    params = init_params(k_p, input_size, hidden_size, output_size)

    # Weight prep hoisted out of the per-call path; meta is closed over (static).
    prep, meta = prepare_params(params, compute_dtype=jnp.float32)
    fwd = jax.jit(functools.partial(mlp_forward, meta=meta, block_batch=512))

    out = jax.block_until_ready(fwd(x, prep))

    ref = reference_forward(x, params)
    assert out.shape == (batch, output_size)
    assert jnp.allclose(out, ref, atol=1e-5, rtol=1e-5)

    print("KERNEL_OK")
</pallas_src>

<mosaic_0001>
module attributes {stable_mosaic.version = 11 : i64} {
  func.func @mlp_kernel(%arg0: i32, %arg1: memref<152x16xf32, #tpu.memory_space<vmem>>, %arg2: memref<16x128xf32, #tpu.memory_space<vmem>>, %arg3: memref<1x128xf32, #tpu.memory_space<vmem>>, %arg4: memref<128x128xf32, #tpu.memory_space<vmem>>, %arg5: memref<1x128xf32, #tpu.memory_space<vmem>>, %arg6: memref<128x128xf32, #tpu.memory_space<vmem>>, %arg7: memref<1x128xf32, #tpu.memory_space<vmem>>, %arg8: memref<152x128xf32, #tpu.memory_space<vmem>>) attributes {dimension_semantics = [#tpu.dimension_semantics<parallel>], iteration_bounds = array<i64: 2>, scalar_prefetch = 0 : i64, scratch_operands = 0 : i64, tpu.core_type = #tpu.core_type<tc>, window_params = [{transform_indices = @transform_0, window_bounds = array<i64: 152, 16>}, {pipeline_mode = #tpu.pipeline_mode<synchronous>, transform_indices = @transform_1, window_bounds = array<i64: 16, 128>}, {pipeline_mode = #tpu.pipeline_mode<synchronous>, transform_indices = @transform_2, window_bounds = array<i64: 1, 128>}, {pipeline_mode = #tpu.pipeline_mode<synchronous>, transform_indices = @transform_3, window_bounds = array<i64: 128, 128>}, {pipeline_mode = #tpu.pipeline_mode<synchronous>, transform_indices = @transform_4, window_bounds = array<i64: 1, 128>}, {pipeline_mode = #tpu.pipeline_mode<synchronous>, transform_indices = @transform_5, window_bounds = array<i64: 128, 128>}, {pipeline_mode = #tpu.pipeline_mode<synchronous>, transform_indices = @transform_6, window_bounds = array<i64: 1, 128>}, {transform_indices = @transform_7, window_bounds = array<i64: 152, 128>}]} {
    %c0 = arith.constant 0 : index
    %c0_0 = arith.constant 0 : index
    %0 = vector.load %arg1[%c0, %c0_0] : memref<152x16xf32, #tpu.memory_space<vmem>>, vector<152x16xf32>
    %c0_1 = arith.constant 0 : index
    %c0_2 = arith.constant 0 : index
    %1 = vector.load %arg2[%c0_1, %c0_2] : memref<16x128xf32, #tpu.memory_space<vmem>>, vector<16x128xf32>
    %cst = arith.constant dense<0.000000e+00> : vector<152x128xf32>
    %2 = tpu.matmul %0, %1, %cst {dimension_numbers = #tpu.dot_dimension_numbers<[1], [0], [0], [1], [0, 0, 1, 1], [], []>} : vector<152x16xf32>, vector<16x128xf32>, vector<152x128xf32> -> vector<152x128xf32>
    %c0_3 = arith.constant 0 : index
    %c0_4 = arith.constant 0 : index
    %3 = vector.load %arg3[%c0_3, %c0_4] : memref<1x128xf32, #tpu.memory_space<vmem>>, vector<1x128xf32>
    %4 = vector.broadcast %3 : vector<1x128xf32> to vector<152x128xf32>
    %5 = arith.addf %2, %4 : vector<152x128xf32>
    %cst_5 = arith.constant 0.000000e+00 : f32
    %6 = vector.broadcast %cst_5 : f32 to vector<152x128xf32>
    %7 = arith.maximumf %5, %6 : vector<152x128xf32>
    %c0_6 = arith.constant 0 : index
    %c0_7 = arith.constant 0 : index
    %8 = vector.load %arg4[%c0_6, %c0_7] : memref<128x128xf32, #tpu.memory_space<vmem>>, vector<128x128xf32>
    %cst_8 = arith.constant dense<0.000000e+00> : vector<152x128xf32>
    %9 = tpu.matmul %7, %8, %cst_8 {dimension_numbers = #tpu.dot_dimension_numbers<[1], [0], [0], [1], [0, 0, 1, 1], [], []>} : vector<152x128xf32>, vector<128x128xf32>, vector<152x128xf32> -> vector<152x128xf32>
    %c0_9 = arith.constant 0 : index
    %c0_10 = arith.constant 0 : index
    %10 = vector.load %arg5[%c0_9, %c0_10] : memref<1x128xf32, #tpu.memory_space<vmem>>, vector<1x128xf32>
    %11 = vector.broadcast %10 : vector<1x128xf32> to vector<152x128xf32>
    %12 = arith.addf %9, %11 : vector<152x128xf32>
    %cst_11 = arith.constant 0.000000e+00 : f32
    %13 = vector.broadcast %cst_11 : f32 to vector<152x128xf32>
    %14 = arith.maximumf %12, %13 : vector<152x128xf32>
    %c0_12 = arith.constant 0 : index
    %c0_13 = arith.constant 0 : index
    %15 = vector.load %arg6[%c0_12, %c0_13] : memref<128x128xf32, #tpu.memory_space<vmem>>, vector<128x128xf32>
    %cst_14 = arith.constant dense<0.000000e+00> : vector<152x128xf32>
    %16 = tpu.matmul %14, %15, %cst_14 {dimension_numbers = #tpu.dot_dimension_numbers<[1], [0], [0], [1], [0, 0, 1, 1], [], []>} : vector<152x128xf32>, vector<128x128xf32>, vector<152x128xf32> -> vector<152x128xf32>
    %c0_15 = arith.constant 0 : index
    %c0_16 = arith.constant 0 : index
    %17 = vector.load %arg7[%c0_15, %c0_16] : memref<1x128xf32, #tpu.memory_space<vmem>>, vector<1x128xf32>
    %18 = vector.broadcast %17 : vector<1x128xf32> to vector<152x128xf32>
    %19 = arith.addf %16, %18 : vector<152x128xf32>
    %c0_17 = arith.constant 0 : index
    %c0_18 = arith.constant 0 : index
    %20 = vector.load %arg8[%c0_17, %c0_18] : memref<152x128xf32, #tpu.memory_space<vmem>>, vector<152x128xf32>
    tpu.vector_store %arg8[%c0_17, %c0_18], %19 {strides = array<i32>} : memref<152x128xf32, #tpu.memory_space<vmem>>, vector<152x128xf32>,
    return
  }
  func.func @transform_0(%arg0: i32) -> (i32, i32) {
    %c0_i32 = arith.constant 0 : i32
    %c0_i32_0 = arith.constant 0 : i32
    return %arg0, %c0_i32 : i32, i32
  }
  func.func @transform_1(%arg0: i32) -> (i32, i32) {
    %c0_i32 = arith.constant 0 : i32
    %c0_i32_0 = arith.constant 0 : i32
    %c0_i32_1 = arith.constant 0 : i32
    return %c0_i32, %c0_i32_0 : i32, i32
  }
  func.func @transform_2(%arg0: i32) -> (i32, i32) {
    %c0_i32 = arith.constant 0 : i32
    %c0_i32_0 = arith.constant 0 : i32
    %c0_i32_1 = arith.constant 0 : i32
    return %c0_i32, %c0_i32_0 : i32, i32
  }
  func.func @transform_3(%arg0: i32) -> (i32, i32) {
    %c0_i32 = arith.constant 0 : i32
    %c0_i32_0 = arith.constant 0 : i32
    %c0_i32_1 = arith.constant 0 : i32
    return %c0_i32, %c0_i32_0 : i32, i32
  }
  func.func @transform_4(%arg0: i32) -> (i32, i32) {
    %c0_i32 = arith.constant 0 : i32
    %c0_i32_0 = arith.constant 0 : i32
    %c0_i32_1 = arith.constant 0 : i32
    return %c0_i32, %c0_i32_0 : i32, i32
  }
  func.func @transform_5(%arg0: i32) -> (i32, i32) {
    %c0_i32 = arith.constant 0 : i32
    %c0_i32_0 = arith.constant 0 : i32
    %c0_i32_1 = arith.constant 0 : i32
    return %c0_i32, %c0_i32_0 : i32, i32
  }
  func.func @transform_6(%arg0: i32) -> (i32, i32) {
    %c0_i32 = arith.constant 0 : i32
    %c0_i32_0 = arith.constant 0 : i32
    %c0_i32_1 = arith.constant 0 : i32
    return %c0_i32, %c0_i32_0 : i32, i32
  }
  func.func @transform_7(%arg0: i32) -> (i32, i32) {
    %c0_i32 = arith.constant 0 : i32
    %c0_i32_0 = arith.constant 0 : i32
    return %arg0, %c0_i32 : i32, i32
  }
}

</mosaic_0001>

<bundles_post_ra>
// kernel: mlp_forward.1
= control target key start
LH: loop header
LB: loop body
LE: loop exit
PB: predicated region body
PF: predicated region fallthrough
CT: control target
= control target key end

     0   :  { %s1483_s24 = smov 0   ;;  %s1883_s0 = inlined_call_operand.vmem [shape: f32[300,16], index: 0, kind: input, shape index: {}]   ;;  %s1884_s1 = inlined_call_operand.vmem [shape: f32[16,128], index: 1, kind: input, shape index: {}]   ;;  %s1885_s2 = inlined_call_operand.vmem [shape: f32[1,128], index: 2, kind: input, shape index: {}]   ;;  %s1886_s3 = inlined_call_operand.vmem [shape: f32[128,128], index: 3, kind: input, shape index: {}]   ;;  %s1887_s4 = inlined_call_operand.vmem [shape: f32[1,128], index: 4, kind: input, shape index: {}]   ;;  %s1888_s5 = inlined_call_operand.vmem [shape: f32[128,128], index: 5, kind: input, shape index: {}]   ;;  %s1889_s6 = inlined_call_operand.vmem [shape: f32[1,128], index: 6, kind: input, shape index: {}]   ;;  %s1890_s7 = inlined_call_operand.vmem [shape: f32[300,128], index: 7, kind: output, shape index: {}]  }
   0x1 LB: > { %s1007_s25 = sadd.s32 4294967295, %s1438_s24   ;;  %p1011_p0 = scmp.ge.s32.totalorder %s1438_s24, 1  ;;  %s1438_s24 = sphi %s1483_s24, %s17_s24  }
   0x2   : > { %p238_p1 = scmp.lt.s32.totalorder %s1438_s24, 3 }
   0x4   : > { %p239_p2 = pnand %p1011_p0, %p238_p1 }
   0x5   : > { %v301_v0 = vld [vmem:[%s1884_s1] sm:$0xff] (!%p239_p2)  ;;  %v302_v1 = vld [vmem:[%s1884_s1 + $0x8] sm:$0xff] (!%p239_p2)  ;;  %s270_s30 = smul.u32 (!%p239_p2), 19, %s1007_s25  ;;  %v1440_v2 = vmov (!%p239_p2), 0.0|0.0   ;;  %vm1441_vm0 = vmmov (!%p239_p2), 0   ;;  %v1442_v4 = vmov (!%p239_p2), 0.0  }
   0x6   : > { %242 = sbr.rel (%p239_p2) target bundleno = 736 (0x2e0), region = 48  ;;  %1368 = vmatprep.subr.bf16.mxu0 (!%p239_p2), %v1440_v2  ;;  %v1369_v3 = vpack.c.bf16 (!%p239_p2), %v302_v1, %v301_v0  ;;  %1133 = vmatprep.mubr.msk.f32.mxu0 (!%p239_p2), %vm1441_vm0, %v1442_v4  ;;  %vm310_vm1 = vcmask (!%p239_p2), 130048   ;;  %v547_v5 = vld [vmem:[%s1886_s3] sm:$0xff] (!%p239_p2)  ;;  %v548_v6 = vld [vmem:[%s1886_s3 + $0x8] sm:$0xff] (!%p239_p2)  ;;  %v549_v11 = vld [vmem:[%s1886_s3 + $0x10] sm:$0xff] (!%p239_p2) }
   0x7   : > { %p271_p3 = scmp.lt.s32.totalorder (!%p239_p2), %s270_s30, 37  ;;  %1419 = vmatprep.subr.bf16.mxu1 (!%p239_p2), %v1440_v2  ;;  %1163 = vmatprep.mubr.msk.f32.mxu1 (!%p239_p2), %vm1441_vm0, %v1442_v4  ;;  %v1372_v9 = vpack.c.bf16 (!%p239_p2), %v548_v6, %v547_v5  ;;  %v550_v12 = vld [vmem:[%s1886_s3 + $0x18] sm:$0xff] (!%p239_p2)  ;;  %v551_v16 = vld [vmem:[%s1886_s3 + $0x20] sm:$0xff] (!%p239_p2)  ;;  %v552_v17 = vld [vmem:[%s1886_s3 + $0x28] sm:$0xff] (!%p239_p2) }
   0x8   : > { %1370 = vmatpush3.bf16.msra.mxu0 (!%p239_p2), %v1369_v3  ;;  %1420 = vmatpush3.bf16.msra.mxu1 (!%p239_p2), %v1369_v3  ;;  %v1375_v15 = vpack.c.bf16 (!%p239_p2), %v550_v12, %v549_v11  ;;  %v1378_v20 = vpack.c.bf16 (!%p239_p2), %v552_v17, %v551_v16  ;;  %v553_v21 = vld [vmem:[%s1886_s3 + $0x30] sm:$0xff] (!%p239_p2)  ;;  %v554_v22 = vld [vmem:[%s1886_s3 + $0x38] sm:$0xff] (!%p239_p2)  ;;  %v555_v26 = vld [vmem:[%s1886_s3 + $0x40] sm:$0xff] (!%p239_p2) }
   0x9   : > { %1371 = vmatprep.subr.bf16.mxu1 (!%p239_p2), %v1440_v2  ;;  %1395 = vmatprep.subr.bf16.mxu0 (!%p239_p2), %v1440_v2  ;;  %v1381_v25 = vpack.c.bf16 (!%p239_p2), %v554_v22, %v553_v21  ;;  %v556_v27 = vld [vmem:[%s1886_s3 + $0x48] sm:$0xff] (!%p239_p2)  ;;  %v557_v31 = vld [vmem:[%s1886_s3 + $0x50] sm:$0xff] (!%p239_p2)  ;;  %v558_v32 = vld [vmem:[%s1886_s3 + $0x58] sm:$0xff] (!%p239_p2) }
   0xa   : > { %v1384_v30 = vpack.c.bf16 (!%p239_p2), %v556_v27, %v555_v26  ;;  %v1387_v35 = vpack.c.bf16 (!%p239_p2), %v558_v32, %v557_v31  ;;  %v559_v36 = vld [vmem:[%s1886_s3 + $0x60] sm:$0xff] (!%p239_p2)  ;;  %v560_v37 = vld [vmem:[%s1886_s3 + $0x68] sm:$0xff] (!%p239_p2)  ;;  %v561_v45 = vld [vmem:[%s1886_s3 + $0x70] sm:$0xff] (!%p239_p2) }
   0xb   : > { %v1390_v40 = vpack.c.bf16 (!%p239_p2), %v560_v37, %v559_v36  ;;  %v562_v46 = vld [vmem:[%s1886_s3 + $0x78] sm:$0xff] (!%p239_p2)  ;;  %v749_v48 = vld [vmem:[%s1888_s5] sm:$0xff] (!%p239_p2)  ;;  %v750_v49 = vld [vmem:[%s1888_s5 + $0x8] sm:$0xff] (!%p239_p2) }
   0xc   : > { %v1393_v47 = vpack.c.bf16 (!%p239_p2), %v562_v46, %v561_v45  ;;  %v751_v50 = vld [vmem:[%s1888_s5 + $0x10] sm:$0xff] (!%p239_p2)  ;;  %v1396_v51 = vpack.c.bf16 (!%p239_p2), %v750_v49, %v749_v48  ;;  %v752_v52 = vld [vmem:[%s1888_s5 + $0x18] sm:$0xff] (!%p239_p2)  ;;  %v753_v54 = vld [vmem:[%s1888_s5 + $0x20] sm:$0xff] (!%p239_p2) }
   0xd   : > { %s1892_s30 = smov (!%p271_p3, %s270_s30), 37  ;;  %v1399_v53 = vpack.c.bf16 %v752_v52, %v751_v50  ;;  %v754_v55 = vld [vmem:[%s1888_s5 + $0x28] sm:$0xff]  ;;  %v755_v57 = vld [vmem:[%s1888_s5 + $0x30] sm:$0xff]  ;;  %v756_v58 = vld [vmem:[%s1888_s5 + $0x38] sm:$0xff] }
   0xe   : > { %s1012_s8 = sshll.u32 %s1892_s30, 3  ;;  %v1402_v56 = vpack.c.bf16 %v754_v55, %v753_v54  ;;  %v1405_v59 = vpack.c.bf16 %v756_v58, %v755_v57  ;;  %v757_v60 = vld [vmem:[%s1888_s5 + $0x40] sm:$0xff]  ;;  %v758_v61 = vld [vmem:[%s1888_s5 + $0x48] sm:$0xff]  ;;  %v759_v63 = vld [vmem:[%s1888_s5 + $0x50] sm:$0xff] }
   0xf   : > { %s1513_s11 = scalar_lea.vmem %s1883_s0, %s1012_s8  ;;  %v1408_v62 = vpack.c.bf16 %v758_v61, %v757_v60  ;;  %v760_v0 = vld [vmem:[%s1888_s5 + $0x58] sm:$0xff]  ;;  %v761_v3 = vld [vmem:[%s1888_s5 + $0x60] sm:$0xff]  ;;  %v762_v5 = vld [vmem:[%s1888_s5 + $0x68] sm:$0xff] }
  0x10   : > { %v282_v7 = vld [vmem:[%s1513_s11] sm:$0xff]  ;;  %v283_v8 = vld [vmem:[%s1513_s11 + $0x8] sm:$0xff]  ;;  %v292_v10 = vld [vmem:[%s1513_s11 + $0x50] sm:$0xff]  ;;  %v1411_v1 = vpack.c.bf16 %v760_v0, %v759_v63  ;;  %v1414_v6 = vpack.c.bf16 %v762_v5, %v761_v3 }
  0x11   : > { %1134 = vmatmul.mubr.msk.f32.vlgmr.msra.gmra.mrb[0].mxu0 %vm310_vm1, %v282_v7  ;;  %1164 = vmatmul.mubr.msk.f32.vlgmr.msra.gmra.mrb[0].mxu1 %vm310_vm1, %v292_v10  ;;  %v293_v13 = vld [vmem:[%s1513_s11 + $0x58] sm:$0xff]  ;;  %v284_v14 = vld [vmem:[%s1513_s11 + $0x10] sm:$0xff]  ;;  %v294_v18 = vld [vmem:[%s1513_s11 + $0x60] sm:$0xff] }
  0x12   : > { %1136 = vmatprep.mubr.msk.f32.mxu0 %vm1441_vm0, %v1442_v4  ;;  %1166 = vmatprep.mubr.msk.f32.mxu1 %vm1441_vm0, %v1442_v4  ;;  %v285_v19 = vld [vmem:[%s1513_s11 + $0x18] sm:$0xff]  ;;  %v295_v23 = vld [vmem:[%s1513_s11 + $0x68] sm:$0xff]  ;;  %v286_v24 = vld [vmem:[%s1513_s11 + $0x20] sm:$0xff] }
  0x13   : > { %1373 = vmatpush3.bf16.msra.mxu1 %v1372_v9  ;;  %v296_v28 = vld [vmem:[%s1513_s11 + $0x70] sm:$0xff]  ;;  %v287_v29 = vld [vmem:[%s1513_s11 + $0x28] sm:$0xff]  ;;  %v297_v33 = vld [vmem:[%s1513_s11 + $0x78] sm:$0xff]  ;;  %1397 = vmatpush3.bf16.msra.mxu0 %v1396_v51 }
  0x14   : > { %1374 = vmatprep.subr.bf16.mxu1 %v1440_v2  ;;  %v288_v34 = vld [vmem:[%s1513_s11 + $0x30] sm:$0xff]  ;;  %v298_v38 = vld [vmem:[%s1513_s11 + $0x80] sm:$0xff]  ;;  %v289_v39 = vld [vmem:[%s1513_s11 + $0x38] sm:$0xff]  ;;  %1398 = vmatprep.subr.bf16.mxu0 %v1440_v2 }
  0x15   : > { %1137 = vmatmul.mubr.msk.f32.gmra.mrb[2].mxu0 %vm310_vm1, %v283_v8  ;;  %1167 = vmatmul.mubr.msk.f32.gmra.mrb[2].mxu1 %vm310_vm1, %v293_v13  ;;  %v299_v41 = vld [vmem:[%s1513_s11 + $0x88] sm:$0xff]  ;;  %v290_v42 = vld [vmem:[%s1513_s11 + $0x40] sm:$0xff]  ;;  %v300_v43 = vld [vmem:[%s1513_s11 + $0x90] sm:$0xff] }
  0x16   : > { %1139 = vmatprep.mubr.msk.f32.mxu0 %vm1441_vm0, %v1442_v4  ;;  %1169 = vmatprep.mubr.msk.f32.mxu1 %vm1441_vm0, %v1442_v4  ;;  %v291_v44 = vld [vmem:[%s1513_s11 + $0x48] sm:$0xff]  ;;  %v1698_v7 = vld [vmem:[%s1885_s2] ss:$0 sm:$0xff]  ;;  %s1840_s11 = scalar_lea.vmem %s1890_s7, %s1012_s8 }
  0x17   : > { %1376 = vmatpush3.bf16.msra.mxu1 %v1375_v15  ;;  %1400 = vmatpush3.bf16.msra.mxu0 %v1399_v53 }
  0x18   : > { %1377 = vmatprep.subr.bf16.mxu1 %v1440_v2  ;;  %1401 = vmatprep.subr.bf16.mxu0 %v1440_v2 }
  0x19   : > { %1140 = vmatmul.mubr.msk.f32.gmra.mrb[4].mxu0 %vm310_vm1, %v284_v14  ;;  %1170 = vmatmul.mubr.msk.f32.gmra.mrb[4].mxu1 %vm310_vm1, %v294_v18 }
  0x1a   : > { %1142 = vmatprep.mubr.msk.f32.mxu0 %vm1441_vm0, %v1442_v4  ;;  %1172 = vmatprep.mubr.msk.f32.mxu1 %vm1441_vm0, %v1442_v4 }
  0x1b   : > { %1379 = vmatpush3.bf16.msra.mxu1 %v1378_v20  ;;  %1403 = vmatpush3.bf16.msra.mxu0 %v1402_v56 }
  0x1c   : > { %1380 = vmatprep.subr.bf16.mxu1 %v1440_v2  ;;  %1404 = vmatprep.subr.bf16.mxu0 %v1440_v2 }
  0x1d   : > { %1143 = vmatmul.mubr.msk.f32.gmra.mrb[6].mxu0 %vm310_vm1, %v285_v19  ;;  %1173 = vmatmul.mubr.msk.f32.gmra.mrb[6].mxu1 %vm310_vm1, %v295_v23 }
  0x1e   : > { %1145 = vmatprep.mubr.msk.f32.mxu0 %vm1441_vm0, %v1442_v4  ;;  %1175 = vmatprep.mubr.msk.f32.mxu1 %vm1441_vm0, %v1442_v4 }
  0x1f   : > { %1382 = vmatpush3.bf16.msra.mxu1 %v1381_v25  ;;  %1406 = vmatpush3.bf16.msra.mxu0 %v1405_v59 }
  0x20   : > { %1383 = vmatprep.subr.bf16.mxu1 %v1440_v2  ;;  %1407 = vmatprep.subr.bf16.mxu0 %v1440_v2 }
  0x21   : > { %1146 = vmatmul.mubr.msk.f32.gmra.mrb[8].mxu0 %vm310_vm1, %v286_v24  ;;  %1176 = vmatmul.mubr.msk.f32.gmra.mrb[8].mxu1 %vm310_vm1, %v296_v28 }
  0x22   : > { %1148 = vmatprep.mubr.msk.f32.mxu0 %vm1441_vm0, %v1442_v4  ;;  %1178 = vmatprep.mubr.msk.f32.mxu1 %vm1441_vm0, %v1442_v4 }
  0x23   : > { %1385 = vmatpush3.bf16.msra.mxu1 %v1384_v30  ;;  %1409 = vmatpush3.bf16.msra.mxu0 %v1408_v62 }
  0x24   : > { %1386 = vmatprep.subr.bf16.mxu1 %v1440_v2  ;;  %1410 = vmatprep.subr.bf16.mxu0 %v1440_v2 }
  0x25   : > { %1149 = vmatmul.mubr.msk.f32.gmra.mrb[10].mxu0 %vm310_vm1, %v287_v29  ;;  %1179 = vmatmul.mubr.msk.f32.gmra.mrb[10].mxu1 %vm310_vm1, %v297_v33 }
  0x26   : > { %1151 = vmatprep.mubr.msk.f32.mxu0 %vm1441_vm0, %v1442_v4  ;;  %1181 = vmatprep.mubr.msk.f32.mxu1 %vm1441_vm0, %v1442_v4 }
  0x27   : > { %1388 = vmatpush3.bf16.msra.mxu1 %v1387_v35  ;;  %1412 = vmatpush3.bf16.msra.mxu0 %v1411_v1 }
  0x28   : > { %1389 = vmatprep.subr.bf16.mxu1 %v1440_v2  ;;  %1413 = vmatprep.subr.bf16.mxu0 %v1440_v2 }
  0x29   : > { %1152 = vmatmul.mubr.msk.f32.gmra.mrb[12].mxu0 %vm310_vm1, %v288_v34  ;;  %1182 = vmatmul.mubr.msk.f32.gmra.mrb[12].mxu1 %vm310_vm1, %v298_v38 }
  0x2a   : > { %1154 = vmatprep.mubr.msk.f32.mxu0 %vm1441_vm0, %v1442_v4  ;;  %1184 = vmatprep.mubr.msk.f32.mxu1 %vm1441_vm0, %v1442_v4 }
  0x2b   : > { %1391 = vmatpush3.bf16.msra.mxu1 %v1390_v40  ;;  %1415 = vmatpush3.bf16.msra.mxu0 %v1414_v6 }
  0x2c   : > { %1392 = vmatprep.subr.bf16.mxu1 %v1440_v2  ;;  %1416 = vmatprep.subr.bf16.mxu0 %v1440_v2 }
  0x2d   : > { %1155 = vmatmul.mubr.msk.f32.gmra.mrb[14].mxu0 %vm310_vm1, %v289_v39  ;;  %1185 = vmatmul.mubr.msk.f32.gmra.mrb[14].mxu1 %vm310_vm1, %v299_v41 }
  0x2e   : > { %1157 = vmatprep.mubr.msk.f32.mxu0 %vm1441_vm0, %v1442_v4  ;;  %1187 = vmatprep.mubr.msk.f32.mxu1 %vm1441_vm0, %v1442_v4 }
  0x2f   : > { %1394 = vmatpush3.bf16.msra.mxu1 %v1393_v47 }
  0x31   : > { %1158 = vmatmul.mubr.msk.f32.gmra.mrb[16].mxu0 %vm310_vm1, %v290_v42  ;;  %1188 = vmatmul.mubr.msk.f32.gmra.mrb[16].mxu1 %vm310_vm1, %v300_v43 }
  0x32   : > { %1160 = vmatprep.mubr.msk.f32.mxu0 %vm1441_vm0, %v1442_v4  ;;  %1222 = vmatprep.mubr.msk.f32.mxu1 %vm1441_vm0, %v1442_v4 }
  0x35   : > { %1161 = vmatmul.mubr.msk.f32.gmra.mrb[18].mxu0 %vm310_vm1, %v291_v44 }
  0x36   : > { %1311 = vmatprep.mubr.msk.f32.mxu0 %vm1441_vm0, %v1442_v4 }
  0xe4   : > { %v434_v8 = vpop.f32.mrb[0].mxu0  ;;  %v1701_v12 = vpop.f32.mrb[0].mxu1 }
  0xe5   : > { %v435_v9 = vadd.f32 %v1698_v7, %v434_v8  ;;  %v1135_v10 = vpop.f32.mrb[1].mxu0  ;;  %v1165_v14 = vpop.f32.mrb[1].mxu1  ;;  %v485_v5 = vadd.f32 %v1698_v7, %v1701_v12 }
  0xe7   : > { %v528_v11 = vmax.f32 %v435_v9, 0.0  ;;  %v538_v8 = vmax.f32 %v485_v5, 0.0 }
  0xe8   : > { %v439_v13 = vpop.f32.mrb[2].mxu0  ;;  %v1706_v17 = vpop.f32.mrb[2].mxu1 }
  0xe9   : > { %v440_v15 = vadd.f32 %v1698_v7, %v439_v13  ;;  %v1138_v16 = vpop.f32.mrb[3].mxu0  ;;  %1223 = vmatmul.mubr.f32.vlgmr.msra.gmra.mrb[18].mxu1 %v528_v11  ;;  %v1168_v19 = vpop.f32.mrb[3].mxu1  ;;  %v490_v9 = vadd.f32 %v1698_v7, %v1706_v17 }
  0xea   : > { %1225 = vmatprep.mubr.msk.f32.mxu1 %vm1441_vm0, %v1442_v4 }
  0xeb   : > { %v529_v2 = vmax.f32 %v440_v15, 0.0  ;;  %v539_v10 = vmax.f32 %v490_v9, 0.0 }
  0xec   : > { %v444_v18 = vpop.f32.mrb[4].mxu0  ;;  %v1711_v23 = vpop.f32.mrb[4].mxu1 }
  0xed   : > { %v445_v20 = vadd.f32 %v1698_v7, %v444_v18  ;;  %v1141_v21 = vpop.f32.mrb[5].mxu0  ;;  %1226 = vmatmul.mubr.f32.gmra.mrb[20].mxu1 %v529_v2  ;;  %v1171_v25 = vpop.f32.mrb[5].mxu1  ;;  %v495_v11 = vadd.f32 %v1698_v7, %v1711_v23  ;;  %v1773_v23 = vld [vmem:[%s1887_s4] ss:$0 sm:$0xff] }
  0xee   : > { %1228 = vmatprep.mubr.msk.f32.mxu1 %vm1441_vm0, %v1442_v4  ;;  %v764_v21 = vld [vmem:[%s1888_s5 + $0x78] sm:$0xff] }
  0xef   : > { %v530_v22 = vmax.f32 %v445_v20, 0.0  ;;  %v540_v12 = vmax.f32 %v495_v11, 0.0 }
  0xf0   : > { %v449_v24 = vpop.f32.mrb[6].mxu0  ;;  %v499_v29 = vpop.f32.mrb[6].mxu1 }
  0xf1   : > { %v450_v26 = vadd.f32 %v1698_v7, %v449_v24  ;;  %v1144_v27 = vpop.f32.mrb[7].mxu0  ;;  %1229 = vmatmul.mubr.f32.gmra.mrb[22].mxu1 %v530_v22  ;;  %v1174_v31 = vpop.f32.mrb[7].mxu1  ;;  %v500_v13 = vadd.f32 %v1698_v7, %v499_v29 }
  0xf2   : > { %1231 = vmatprep.mubr.msk.f32.mxu1 %vm1441_vm0, %v1442_v4 }
  0xf3   : > { %v531_v28 = vmax.f32 %v450_v26, 0.0  ;;  %v541_v14 = vmax.f32 %v500_v13, 0.0 }
  0xf4   : > { %v454_v30 = vpop.f32.mrb[8].mxu0  ;;  %v504_v35 = vpop.f32.mrb[8].mxu1 }
  0xf5   : > { %v455_v32 = vadd.f32 %v1698_v7, %v454_v30  ;;  %v1147_v33 = vpop.f32.mrb[9].mxu0  ;;  %1232 = vmatmul.mubr.f32.gmra.mrb[24].mxu1 %v531_v28  ;;  %v1177_v37 = vpop.f32.mrb[9].mxu1  ;;  %v505_v15 = vadd.f32 %v1698_v7, %v504_v35 }
  0xf6   : > { %1234 = vmatprep.mubr.msk.f32.mxu1 %vm1441_vm0, %v1442_v4 }
  0xf7   : > { %v532_v34 = vmax.f32 %v455_v32, 0.0  ;;  %v542_v16 = vmax.f32 %v505_v15, 0.0 }
  0xf8   : > { %v459_v36 = vpop.f32.mrb[10].mxu0  ;;  %v509_v41 = vpop.f32.mrb[10].mxu1 }
  0xf9   : > { %v460_v38 = vadd.f32 %v1698_v7, %v459_v36  ;;  %v1150_v39 = vpop.f32.mrb[11].mxu0  ;;  %1235 = vmatmul.mubr.f32.gmra.mrb[26].mxu1 %v532_v34  ;;  %v1180_v43 = vpop.f32.mrb[11].mxu1  ;;  %v510_v2 = vadd.f32 %v1698_v7, %v509_v41 }
  0xfa   : > { %1237 = vmatprep.mubr.msk.f32.mxu1 %vm1441_vm0, %v1442_v4 }
  0xfb   : > { %v533_v40 = vmax.f32 %v460_v38, 0.0  ;;  %v543_v17 = vmax.f32 %v510_v2, 0.0 }
  0xfc   : > { %v464_v42 = vpop.f32.mrb[12].mxu0  ;;  %v514_v47 = vpop.f32.mrb[12].mxu1 }
  0xfd   : > { %v465_v44 = vadd.f32 %v1698_v7, %v464_v42  ;;  %v1153_v45 = vpop.f32.mrb[13].mxu0  ;;  %1238 = vmatmul.mubr.f32.gmra.mrb[28].mxu1 %v533_v40  ;;  %v515_v49 = vadd.f32 %v1698_v7, %v514_v47  ;;  %v1183_v50 = vpop.f32.mrb[13].mxu1 }
  0xfe   : > { %1240 = vmatprep.mubr.msk.f32.mxu1 %vm1441_vm0, %v1442_v4 }
  0xff   : > { %v534_v46 = vmax.f32 %v465_v44, 0.0  ;;  %v544_v18 = vmax.f32 %v515_v49, 0.0 }
 0x100   : > { %v469_v48 = vpop.f32.mrb[14].mxu0  ;;  %v519_v54 = vpop.f32.mrb[14].mxu1 }
 0x101   : > { %v470_v51 = vadd.f32 %v1698_v7, %v469_v48  ;;  %v1156_v52 = vpop.f32.mrb[15].mxu0  ;;  %1241 = vmatmul.mubr.f32.gmra.mrb[30].mxu1 %v534_v46  ;;  %v520_v56 = vadd.f32 %v1698_v7, %v519_v54  ;;  %v1186_v57 = vpop.f32.mrb[15].mxu1 }
 0x102   : > { %1243 = vmatprep.mubr.msk.f32.mxu1 %vm1441_vm0, %v1442_v4 }
 0x103   : > { %v535_v53 = vmax.f32 %v470_v51, 0.0  ;;  %v545_v19 = vmax.f32 %v520_v56, 0.0 }
 0x104   : > { %v474_v55 = vpop.f32.mrb[16].mxu0  ;;  %v524_v61 = vpop.f32.mrb[16].mxu1 }
 0x105   : > { %v475_v58 = vadd.f32 %v1698_v7, %v474_v55  ;;  %v1159_v59 = vpop.f32.mrb[17].mxu0  ;;  %1244 = vmatmul.mubr.f32.gmra.mrb[32].mxu1 %v535_v53  ;;  %v525_v63 = vadd.f32 %v1698_v7, %v524_v61  ;;  %v1189_v0 = vpop.f32.mrb[17].mxu1 }
 0x106   : > { %1246 = vmatprep.mubr.msk.f32.mxu1 %vm1441_vm0, %v1442_v4 }
 0x107   : > { %v536_v60 = vmax.f32 %v475_v58, 0.0  ;;  %v546_v20 = vmax.f32 %v525_v63, 0.0 }
 0x108   : > { %v479_v62 = vpop.f32.mrb[18].mxu0 }
 0x109   : > { %v480_v1 = vadd.f32 %v1698_v7, %v479_v62  ;;  %v1162_v3 = vpop.f32.mrb[19].mxu0  ;;  %1247 = vmatmul.mubr.f32.gmra.mrb[34].mxu1 %v536_v60  ;;  %v763_v7 = vld [vmem:[%s1888_s5 + $0x70] sm:$0xff] }
 0x10a   : > { %1249 = vmatprep.mubr.msk.f32.mxu1 %vm1441_vm0, %v1442_v4  ;;  %v1417_v22 = vpack.c.bf16 %v764_v21, %v763_v7 }
 0x10b   : > { %v537_v6 = vmax.f32 %v480_v1, 0.0 }
 0x10c   : > { %1418 = vmatpush3.bf16.msra.mxu0 %v1417_v22 }
 0x10d   : > { %1250 = vmatmul.mubr.f32.gmra.mrb[36].mxu1 %v537_v6 }
 0x10e   : > { %1252 = vmatprep.mubr.msk.f32.mxu1 %vm1441_vm0, %v1442_v4 }
 0x111   : > { %1253 = vmatmul.mubr.f32.gmra.mrb[38].mxu1 %v538_v8 }
 0x112   : > { %1255 = vmatprep.mubr.msk.f32.mxu1 %vm1441_vm0, %v1442_v4 }
 0x115   : > { %1256 = vmatmul.mubr.f32.gmra.mrb[40].mxu1 %v539_v10 }
 0x116   : > { %1258 = vmatprep.mubr.msk.f32.mxu1 %vm1441_vm0, %v1442_v4 }
 0x119   : > { %1259 = vmatmul.mubr.f32.gmra.mrb[42].mxu1 %v540_v12 }
 0x11a   : > { %1261 = vmatprep.mubr.msk.f32.mxu1 %vm1441_vm0, %v1442_v4 }
 0x11d   : > { %1262 = vmatmul.mubr.f32.gmra.mrb[44].mxu1 %v541_v14 }
 0x11e   : > { %1264 = vmatprep.mubr.msk.f32.mxu1 %vm1441_vm0, %v1442_v4 }
 0x121   : > { %1265 = vmatmul.mubr.f32.gmra.mrb[46].mxu1 %v542_v16 }
 0x122   : > { %1267 = vmatprep.mubr.msk.f32.mxu1 %vm1441_vm0, %v1442_v4 }
 0x125   : > { %1268 = vmatmul.mubr.f32.gmra.mrb[48].mxu1 %v543_v17 }
 0x126   : > { %1270 = vmatprep.mubr.msk.f32.mxu1 %vm1441_vm0, %v1442_v4 }
 0x129   : > { %1271 = vmatmul.mubr.f32.gmra.mrb[50].mxu1 %v544_v18 }
 0x12a   : > { %1273 = vmatprep.mubr.msk.f32.mxu1 %vm1441_vm0, %v1442_v4 }
 0x12d   : > { %1274 = vmatmul.mubr.f32.gmra.mrb[52].mxu1 %v545_v19 }
 0x12e   : > { %1276 = vmatprep.mubr.msk.f32.mxu1 %vm1441_vm0, %v1442_v4 }
 0x131   : > { %1277 = vmatmul.mubr.f32.gmra.mrb[54].mxu1 %v546_v20 }
 0x1bc   : > { %v636_v24 = vpop.f32.mrb[18].mxu1 }
 0x1bd   : > { %v637_v25 = vadd.f32 %v1773_v23, %v636_v24  ;;  %v1224_v26 = vpop.f32.mrb[19].mxu1 }
 0x1bf   : > { %v730_v27 = vmax.f32 %v637_v25, 0.0 }
 0x1c0   : > { %v641_v28 = vpop.f32.mrb[20].mxu1 }
 0x1c1   : > { %v642_v29 = vadd.f32 %v1773_v23, %v641_v28  ;;  %v1227_v30 = vpop.f32.mrb[21].mxu1  ;;  %1312 = vmatmul.mubr.f32.vlgmr.msra.gmra.mrb[20].mxu0 %v730_v27 }
 0x1c2   : > { %1314 = vmatprep.mubr.msk.f32.mxu0 %vm1441_vm0, %v1442_v4 }
 0x1c3   : > { %v731_v31 = vmax.f32 %v642_v29, 0.0 }
 0x1c4   : > { %v646_v32 = vpop.f32.mrb[22].mxu1 }
 0x1c5   : > { %v647_v33 = vadd.f32 %v1773_v23, %v646_v32  ;;  %v1230_v34 = vpop.f32.mrb[23].mxu1  ;;  %1315 = vmatmul.mubr.f32.gmra.mrb[22].mxu0 %v731_v31 }
 0x1c6   : > { %1317 = vmatprep.mubr.msk.f32.mxu0 %vm1441_vm0, %v1442_v4 }
 0x1c7   : > { %v732_v35 = vmax.f32 %v647_v33, 0.0 }
 0x1c8   : > { %v651_v36 = vpop.f32.mrb[24].mxu1 }
 0x1c9   : > { %v652_v37 = vadd.f32 %v1773_v23, %v651_v36  ;;  %v1233_v38 = vpop.f32.mrb[25].mxu1  ;;  %1318 = vmatmul.mubr.f32.gmra.mrb[24].mxu0 %v732_v35 }
 0x1ca   : > { %1320 = vmatprep.mubr.msk.f32.mxu0 %vm1441_vm0, %v1442_v4  ;;  %v1833_v38 = vld [vmem:[%s1889_s6] ss:$0 sm:$0xff] }
 0x1cb   : > { %v733_v39 = vmax.f32 %v652_v37, 0.0 }
 0x1cc   : > { %v656_v40 = vpop.f32.mrb[26].mxu1 }
 0x1cd   : > { %v657_v41 = vadd.f32 %v1773_v23, %v656_v40  ;;  %v1236_v42 = vpop.f32.mrb[27].mxu1  ;;  %1321 = vmatmul.mubr.f32.gmra.mrb[26].mxu0 %v733_v39 }
 0x1ce   : > { %1323 = vmatprep.mubr.msk.f32.mxu0 %vm1441_vm0, %v1442_v4 }
 0x1cf   : > { %v734_v43 = vmax.f32 %v657_v41, 0.0 }
 0x1d0   : > { %v661_v44 = vpop.f32.mrb[28].mxu1 }
 0x1d1   : > { %v662_v45 = vadd.f32 %v1773_v23, %v661_v44  ;;  %v1239_v46 = vpop.f32.mrb[29].mxu1  ;;  %1324 = vmatmul.mubr.f32.gmra.mrb[28].mxu0 %v734_v43 }
 0x1d2   : > { %1326 = vmatprep.mubr.msk.f32.mxu0 %vm1441_vm0, %v1442_v4 }
 0x1d3   : > { %v735_v47 = vmax.f32 %v662_v45, 0.0 }
 0x1d4   : > { %v666_v48 = vpop.f32.mrb[30].mxu1 }
 0x1d5   : > { %v667_v49 = vadd.f32 %v1773_v23, %v666_v48  ;;  %v1242_v50 = vpop.f32.mrb[31].mxu1  ;;  %1327 = vmatmul.mubr.f32.gmra.mrb[30].mxu0 %v735_v47 }
 0x1d6   : > { %1329 = vmatprep.mubr.msk.f32.mxu0 %vm1441_vm0, %v1442_v4 }
 0x1d7   : > { %v736_v51 = vmax.f32 %v667_v49, 0.0 }
 0x1d8   : > { %v671_v52 = vpop.f32.mrb[32].mxu1 }
 0x1d9   : > { %v672_v53 = vadd.f32 %v1773_v23, %v671_v52  ;;  %v1245_v54 = vpop.f32.mrb[33].mxu1  ;;  %1330 = vmatmul.mubr.f32.gmra.mrb[32].mxu0 %v736_v51 }
 0x1da   : > { %1332 = vmatprep.mubr.msk.f32.mxu0 %vm1441_vm0, %v1442_v4 }
 0x1db   : > { %v737_v55 = vmax.f32 %v672_v53, 0.0 }
 0x1dc   : > { %v676_v56 = vpop.f32.mrb[34].mxu1 }
 0x1dd   : > { %v677_v57 = vadd.f32 %v1773_v23, %v676_v56  ;;  %v1248_v58 = vpop.f32.mrb[35].mxu1  ;;  %1333 = vmatmul.mubr.f32.gmra.mrb[34].mxu0 %v737_v55 }
 0x1de   : > { %1335 = vmatprep.mubr.msk.f32.mxu0 %vm1441_vm0, %v1442_v4 }
 0x1df   : > { %v738_v59 = vmax.f32 %v677_v57, 0.0 }
 0x1e0   : > { %v681_v60 = vpop.f32.mrb[36].mxu1 }
 0x1e1   : > { %v682_v61 = vadd.f32 %v1773_v23, %v681_v60  ;;  %v1251_v62 = vpop.f32.mrb[37].mxu1  ;;  %1336 = vmatmul.mubr.f32.gmra.mrb[36].mxu0 %v738_v59 }
 0x1e2   : > { %1338 = vmatprep.mubr.msk.f32.mxu0 %vm1441_vm0, %v1442_v4 }
 0x1e3   : > { %v739_v63 = vmax.f32 %v682_v61, 0.0 }
 0x1e4   : > { %v686_v0 = vpop.f32.mrb[38].mxu1 }
 0x1e5   : > { %v687_v1 = vadd.f32 %v1773_v23, %v686_v0  ;;  %v1254_v3 = vpop.f32.mrb[39].mxu1  ;;  %1339 = vmatmul.mubr.f32.gmra.mrb[38].mxu0 %v739_v63 }
 0x1e6   : > { %1341 = vmatprep.mubr.msk.f32.mxu0 %vm1441_vm0, %v1442_v4 }
 0x1e7   : > { %v740_v5 = vmax.f32 %v687_v1, 0.0 }
 0x1e8   : > { %v691_v6 = vpop.f32.mrb[40].mxu1 }
 0x1e9   : > { %v692_v8 = vadd.f32 %v1773_v23, %v691_v6  ;;  %v1257_v9 = vpop.f32.mrb[41].mxu1  ;;  %1342 = vmatmul.mubr.f32.gmra.mrb[40].mxu0 %v740_v5 }
 0x1ea   : > { %1344 = vmatprep.mubr.msk.f32.mxu0 %vm1441_vm0, %v1442_v4 }
 0x1eb   : > { %v741_v10 = vmax.f32 %v692_v8, 0.0 }
 0x1ec   : > { %v696_v11 = vpop.f32.mrb[42].mxu1 }
 0x1ed   : > { %v697_v12 = vadd.f32 %v1773_v23, %v696_v11  ;;  %v1260_v13 = vpop.f32.mrb[43].mxu1  ;;  %1345 = vmatmul.mubr.f32.gmra.mrb[42].mxu0 %v741_v10 }
 0x1ee   : > { %1347 = vmatprep.mubr.msk.f32.mxu0 %vm1441_vm0, %v1442_v4 }
 0x1ef   : > { %v742_v14 = vmax.f32 %v697_v12, 0.0 }
 0x1f0   : > { %v701_v15 = vpop.f32.mrb[44].mxu1 }
 0x1f1   : > { %v702_v16 = vadd.f32 %v1773_v23, %v701_v15  ;;  %v1263_v2 = vpop.f32.mrb[45].mxu1  ;;  %1348 = vmatmul.mubr.f32.gmra.mrb[44].mxu0 %v742_v14 }
 0x1f2   : > { %1350 = vmatprep.mubr.msk.f32.mxu0 %vm1441_vm0, %v1442_v4 }
 0x1f3   : > { %v743_v17 = vmax.f32 %v702_v16, 0.0 }
 0x1f4   : > { %v706_v18 = vpop.f32.mrb[46].mxu1 }
 0x1f5   : > { %v707_v19 = vadd.f32 %v1773_v23, %v706_v18  ;;  %v1266_v20 = vpop.f32.mrb[47].mxu1  ;;  %1351 = vmatmul.mubr.f32.gmra.mrb[46].mxu0 %v743_v17 }
 0x1f6   : > { %1353 = vmatprep.mubr.msk.f32.mxu0 %vm1441_vm0, %v1442_v4 }
 0x1f7   : > { %v744_v7 = vmax.f32 %v707_v19, 0.0 }
 0x1f8   : > { %v711_v21 = vpop.f32.mrb[48].mxu1 }
 0x1f9   : > { %v712_v22 = vadd.f32 %v1773_v23, %v711_v21  ;;  %v1269_v24 = vpop.f32.mrb[49].mxu1  ;;  %1354 = vmatmul.mubr.f32.gmra.mrb[48].mxu0 %v744_v7 }
 0x1fa   : > { %1356 = vmatprep.mubr.msk.f32.mxu0 %vm1441_vm0, %v1442_v4 }
 0x1fb   : > { %v745_v25 = vmax.f32 %v712_v22, 0.0 }
 0x1fc   : > { %v716_v26 = vpop.f32.mrb[50].mxu1 }
 0x1fd   : > { %v717_v27 = vadd.f32 %v1773_v23, %v716_v26  ;;  %v1272_v28 = vpop.f32.mrb[51].mxu1  ;;  %1357 = vmatmul.mubr.f32.gmra.mrb[50].mxu0 %v745_v25 }
 0x1fe   : > { %1359 = vmatprep.mubr.msk.f32.mxu0 %vm1441_vm0, %v1442_v4 }
 0x1ff   : > { %v746_v29 = vmax.f32 %v717_v27, 0.0 }
 0x200   : > { %v721_v30 = vpop.f32.mrb[52].mxu1 }
 0x201   : > { %v722_v31 = vadd.f32 %v1773_v23, %v721_v30  ;;  %v1275_v32 = vpop.f32.mrb[53].mxu1  ;;  %1360 = vmatmul.mubr.f32.gmra.mrb[52].mxu0 %v746_v29 }
 0x202   : > { %1362 = vmatprep.mubr.msk.f32.mxu0 %vm1441_vm0, %v1442_v4 }
 0x203   : > { %v747_v33 = vmax.f32 %v722_v31, 0.0 }
 0x204   : > { %v726_v34 = vpop.f32.mrb[54].mxu1 }
 0x205   : > { %v727_v35 = vadd.f32 %v1773_v23, %v726_v34  ;;  %v1278_v36 = vpop.f32.mrb[55].mxu1  ;;  %1363 = vmatmul.mubr.f32.gmra.mrb[54].mxu0 %v747_v33 }
 0x206   : > { %1365 = vmatprep.mubr.msk.f32.mxu0 %vm1441_vm0, %v1442_v4 }
 0x207   : > { %v748_v37 = vmax.f32 %v727_v35, 0.0 }
 0x209   : > { %1366 = vmatmul.mubr.f32.gmra.mrb[56].mxu0 %v748_v37 }
 0x294   : > { %v838_v23 = vpop.f32.mrb[20].mxu0 }
 0x295   : > { %v839_v4 = vadd.f32 %v1833_v38, %v838_v23  ;;  %v1313_v39 = vpop.f32.mrb[21].mxu0 }
 0x297   : > { %932 = vst [vmem:[%s1840_s11] sm:$0xff] %v839_v4 }
 0x298   : > { %v843_v40 = vpop.f32.mrb[22].mxu0 }
 0x299   : > { %v844_v41 = vadd.f32 %v1833_v38, %v843_v40  ;;  %v1316_v42 = vpop.f32.mrb[23].mxu0 }
 0x29b   : > { %933 = vst [vmem:[%s1840_s11 + $0x8] sm:$0xff] %v844_v41 }
 0x29c   : > { %v848_v43 = vpop.f32.mrb[24].mxu0 }
 0x29d   : > { %v849_v44 = vadd.f32 %v1833_v38, %v848_v43  ;;  %v1319_v45 = vpop.f32.mrb[25].mxu0 }
 0x29f   : > { %934 = vst [vmem:[%s1840_s11 + $0x10] sm:$0xff] %v849_v44 }
 0x2a0   : > { %v853_v46 = vpop.f32.mrb[26].mxu0 }
 0x2a1   : > { %v854_v47 = vadd.f32 %v1833_v38, %v853_v46  ;;  %v1322_v48 = vpop.f32.mrb[27].mxu0 }
 0x2a3   : > { %935 = vst [vmem:[%s1840_s11 + $0x18] sm:$0xff] %v854_v47 }
 0x2a4   : > { %v858_v49 = vpop.f32.mrb[28].mxu0 }
 0x2a5   : > { %v859_v50 = vadd.f32 %v1833_v38, %v858_v49  ;;  %v1325_v51 = vpop.f32.mrb[29].mxu0 }
 0x2a7   : > { %936 = vst [vmem:[%s1840_s11 + $0x20] sm:$0xff] %v859_v50 }
 0x2a8   : > { %v863_v52 = vpop.f32.mrb[30].mxu0 }
 0x2a9   : > { %v864_v53 = vadd.f32 %v1833_v38, %v863_v52  ;;  %v1328_v54 = vpop.f32.mrb[31].mxu0 }
 0x2ab   : > { %937 = vst [vmem:[%s1840_s11 + $0x28] sm:$0xff] %v864_v53 }
 0x2ac   : > { %v868_v55 = vpop.f32.mrb[32].mxu0 }
 0x2ad   : > { %v869_v56 = vadd.f32 %v1833_v38, %v868_v55  ;;  %v1331_v57 = vpop.f32.mrb[33].mxu0 }
 0x2af   : > { %938 = vst [vmem:[%s1840_s11 + $0x30] sm:$0xff] %v869_v56 }
 0x2b0   : > { %v873_v58 = vpop.f32.mrb[34].mxu0 }
 0x2b1   : > { %v874_v59 = vadd.f32 %v1833_v38, %v873_v58  ;;  %v1334_v60 = vpop.f32.mrb[35].mxu0 }
 0x2b3   : > { %939 = vst [vmem:[%s1840_s11 + $0x38] sm:$0xff] %v874_v59 }
 0x2b4   : > { %v878_v61 = vpop.f32.mrb[36].mxu0 }
 0x2b5   : > { %v879_v62 = vadd.f32 %v1833_v38, %v878_v61  ;;  %v1337_v63 = vpop.f32.mrb[37].mxu0 }
 0x2b7   : > { %940 = vst [vmem:[%s1840_s11 + $0x40] sm:$0xff] %v879_v62 }
 0x2b8   : > { %v883_v0 = vpop.f32.mrb[38].mxu0 }
 0x2b9   : > { %v884_v1 = vadd.f32 %v1833_v38, %v883_v0  ;;  %v1340_v3 = vpop.f32.mrb[39].mxu0 }
 0x2bb   : > { %941 = vst [vmem:[%s1840_s11 + $0x48] sm:$0xff] %v884_v1 }
 0x2bc   : > { %v888_v5 = vpop.f32.mrb[40].mxu0 }
 0x2bd   : > { %v889_v6 = vadd.f32 %v1833_v38, %v888_v5  ;;  %v1343_v8 = vpop.f32.mrb[41].mxu0 }
 0x2bf   : > { %942 = vst [vmem:[%s1840_s11 + $0x50] sm:$0xff] %v889_v6 }
 0x2c0   : > { %v893_v9 = vpop.f32.mrb[42].mxu0 }
 0x2c1   : > { %v894_v10 = vadd.f32 %v1833_v38, %v893_v9  ;;  %v1346_v11 = vpop.f32.mrb[43].mxu0 }
 0x2c3   : > { %943 = vst [vmem:[%s1840_s11 + $0x58] sm:$0xff] %v894_v10 }
 0x2c4   : > { %v898_v12 = vpop.f32.mrb[44].mxu0 }
 0x2c5   : > { %v899_v13 = vadd.f32 %v1833_v38, %v898_v12  ;;  %v1349_v14 = vpop.f32.mrb[45].mxu0 }
 0x2c7   : > { %944 = vst [vmem:[%s1840_s11 + $0x60] sm:$0xff] %v899_v13 }
 0x2c8   : > { %v903_v15 = vpop.f32.mrb[46].mxu0 }
 0x2c9   : > { %v904_v16 = vadd.f32 %v1833_v38, %v903_v15  ;;  %v1352_v2 = vpop.f32.mrb[47].mxu0 }
 0x2cb   : > { %945 = vst [vmem:[%s1840_s11 + $0x68] sm:$0xff] %v904_v16 }
 0x2cc   : > { %v908_v17 = vpop.f32.mrb[48].mxu0 }
 0x2cd   : > { %v909_v18 = vadd.f32 %v1833_v38, %v908_v17  ;;  %v1355_v19 = vpop.f32.mrb[49].mxu0 }
 0x2cf   : > { %946 = vst [vmem:[%s1840_s11 + $0x70] sm:$0xff] %v909_v18 }
 0x2d0   : > { %v913_v20 = vpop.f32.mrb[50].mxu0 }
 0x2d1   : > { %v914_v7 = vadd.f32 %v1833_v38, %v913_v20  ;;  %v1358_v21 = vpop.f32.mrb[51].mxu0 }
 0x2d3   : > { %947 = vst [vmem:[%s1840_s11 + $0x78] sm:$0xff] %v914_v7 }
 0x2d4   : > { %v918_v22 = vpop.f32.mrb[52].mxu0 }
 0x2d5   : > { %v919_v24 = vadd.f32 %v1833_v38, %v918_v22  ;;  %v1361_v25 = vpop.f32.mrb[53].mxu0 }
 0x2d7   : > { %948 = vst [vmem:[%s1840_s11 + $0x80] sm:$0xff] %v919_v24 }
 0x2d8   : > { %v923_v26 = vpop.f32.mrb[54].mxu0 }
 0x2d9   : > { %v924_v27 = vadd.f32 %v1833_v38, %v923_v26  ;;  %v1364_v28 = vpop.f32.mrb[55].mxu0 }
 0x2db   : > { %949 = vst [vmem:[%s1840_s11 + $0x88] sm:$0xff] %v924_v27 }
 0x2dc   : > { %v928_v29 = vpop.f32.mrb[56].mxu0 }
 0x2dd   : > { %v929_v30 = vadd.f32 %v1833_v38, %v928_v29  ;;  %v1367_v31 = vpop.f32.mrb[57].mxu0 }
 0x2df   : > { %950 = vst [vmem:[%s1840_s11 + $0x90] sm:$0xff] %v929_v30 }
 0x2e0 PF: > { %s17_s24 = sadd.s32 1, %s1438_s24  }
 0x2e1   : > { %p14_p4 = scmp.ge.s32.totalorder %s17_s24, 4  }
 0x2e3   :  { %16 = sbr.rel (!%p14_p4) target bundleno = 1 (0x1), region = 78 }

</bundles_post_ra>
